<compile_context>
chip_gen: v6e
topology: v6e:2x2x1
jax: 0.10.0
libtpu: 0.0.40
codegen_flags: <defaults>
</compile_context>

<pallas_src>
import functools

import jax
import jax.numpy as jnp
from jax.experimental import pallas as pl
from jax.experimental.pallas import tpu as pltpu


def _double_conv_kernel(x_ref, w1_ref, s1_ref, b1_ref, w2_ref, s2_ref, b2_ref,
                        o_ref, patch_ref, *, H, W):
    """Fused DoubleConv for one image.  Channels on sublanes, S=H*W on lanes.

    x_ref:     (1, Cin,  S)      flattened input image
    w*_ref:    (Cout, 9*Cin)     conv taps, column = (ky*3+kx)*Cin + cin
    s*_ref:    (Cout, 1)         folded BN scale = gamma / sqrt(var + eps)
    b*_ref:    (Cout, 1)         folded BN shift = beta + (bias - mean) * scale
    o_ref:     (1, Cout, S)
    patch_ref: (9*Cmax, S)       shared im2col patch matrix (VMEM scratch)
    """
    S = H * W

    # Boundary-validity masks (built once, shared by both stages).  A tap that
    # looks at row r+dy / col c+dx must be zeroed where that neighbor falls
    # outside the image.
    q = jax.lax.broadcasted_iota(jnp.int32, (1, S), 1)
    if (W & (W - 1)) == 0:
        col = jnp.bitwise_and(q, W - 1)
    else:
        col = jax.lax.rem(q, W)
    left_ok = col >= 1           # taps with dx == -1
    right_ok = col <= W - 2      # taps with dx == +1
    top_ok = q >= W              # taps with dy == -1
    bot_ok = q < S - W           # taps with dy == +1

    def stage(xf, w, scale, shift):
        c = xf.shape[0]
        # im2col via XLU lane rotation: patch row block `tap` holds the image
        # shifted by (dy*W + dx) in flattened coordinates, with out-of-image
        # neighbors zeroed by the masks above.
        tap = 0
        for dy in (-1, 0, 1):
            for dx in (-1, 0, 1):
                off = dy * W + dx                       # static
                if off == 0:
                    piece = xf
                else:
                    # roll semantics match jnp.roll: out[q] = in[(q - shift) % S],
                    # so shift = (-off) % S gives out[q] = in[q + off].
                    piece = pltpu.roll(xf, shift=(-off) % S, axis=1)
                mask = None
                if dy == -1:
                    mask = top_ok
                elif dy == 1:
                    mask = bot_ok
                if dx == -1:
                    mask = left_ok if mask is None else jnp.logical_and(mask, left_ok)
                elif dx == 1:
                    mask = right_ok if mask is None else jnp.logical_and(mask, right_ok)
                if mask is not None:
                    piece = jnp.where(mask, piece, 0.0)
                patch_ref[tap * c:(tap + 1) * c, :] = piece
                tap += 1

        # One MXU push: (Cout, 9*Cin) @ (9*Cin, S) -> lane-dense (Cout, S).
        acc = jnp.dot(w, patch_ref[0:9 * c, :], preferred_element_type=jnp.float32)
        return jnp.maximum(acc * scale + shift, 0.0)    # folded bias/BN + ReLU

    h1 = stage(x_ref[0], w1_ref[...], s1_ref[...], b1_ref[...])
    h2 = stage(h1, w2_ref[...], s2_ref[...], b2_ref[...])
    o_ref[0] = h2.astype(o_ref.dtype)


def double_conv(x_nchw, params):
    """(N, Cin, H, W) -> (N, Cout, H, W); PyTorch NCHW layout, no transposes."""
    (w1, s1, b1), (w2, s2, b2) = params
    N, Cin, H, W = x_nchw.shape
    Cmid = w1.shape[0]
    Cout = w2.shape[0]
    S = H * W
    Cmax = max(Cin, Cmid)

    xf = x_nchw.reshape(N, Cin, S)   # contiguous reshape: no data movement

    out = pl.pallas_call(
        functools.partial(_double_conv_kernel, H=H, W=W),
        out_shape=jax.ShapeDtypeStruct((N, Cout, S), jnp.float32),
        grid_spec=pltpu.PrefetchScalarGridSpec(
            num_scalar_prefetch=0,
            grid=(N,),
            in_specs=[
                pl.BlockSpec((1, Cin, S), lambda n: (n, 0, 0)),
                pl.BlockSpec((Cmid, 9 * Cin), lambda n: (0, 0)),
                pl.BlockSpec((Cmid, 1), lambda n: (0, 0)),
                pl.BlockSpec((Cmid, 1), lambda n: (0, 0)),
                pl.BlockSpec((Cout, 9 * Cmid), lambda n: (0, 0)),
                pl.BlockSpec((Cout, 1), lambda n: (0, 0)),
                pl.BlockSpec((Cout, 1), lambda n: (0, 0)),
            ],
            out_specs=pl.BlockSpec((1, Cout, S), lambda n: (n, 0, 0)),
            scratch_shapes=[
                pltpu.VMEM((9 * Cmax, S), jnp.float32),   # shared by both stages
            ],
        ),
        compiler_params=pltpu.CompilerParams(
            dimension_semantics=("parallel",)),
    )(xf, w1, s1, b1, w2, s2, b2)

    return out.reshape(N, Cout, H, W)


in_conv_forward = jax.jit(double_conv)


def _init_layer_params(key, cin, cout):
    """Synthetic Conv2d(cin, cout, 3, padding=1) + BatchNorm2d(cout) parameters."""
    kw, kb, kg, kbeta = jax.random.split(key, 4)
    # PyTorch conv weight (cout, cin, 3, 3) -> (cout, 3, 3, cin) -> (cout, 9*cin),
    # so column index = (ky*3 + kx)*cin + ci, matching the kernel's patch layout.
    w_torch = jax.random.normal(kw, (cout, cin, 3, 3), jnp.float32) * 0.1
    w_mat = jnp.transpose(w_torch, (0, 2, 3, 1)).reshape(cout, 9 * cin)
    conv_bias = jax.random.normal(kb, (cout,), jnp.float32) * 0.1

    # BatchNorm, eval semantics: running_mean=0, running_var=1, affine gamma/beta.
    gamma = 1.0 + 0.1 * jax.random.normal(kg, (cout,), jnp.float32)
    beta = 0.1 * jax.random.normal(kbeta, (cout,), jnp.float32)
    running_mean = jnp.zeros((cout,), jnp.float32)
    running_var = jnp.ones((cout,), jnp.float32)
    eps = 1e-5

    scale = gamma / jnp.sqrt(running_var + eps)
    shift = beta + (conv_bias - running_mean) * scale
    return w_mat, scale.reshape(cout, 1), shift.reshape(cout, 1)


def _reference_forward(x_nchw, params):
    """Pure-JAX reference (lax.conv) used only as a sanity check."""
    out = x_nchw
    for (w_mat, scale, shift) in params:
        cout = w_mat.shape[0]
        cin = w_mat.shape[1] // 9
        w_oihw = jnp.transpose(w_mat.reshape(cout, 3, 3, cin), (0, 3, 1, 2))
        y = jax.lax.conv_general_dilated(
            out, w_oihw, window_strides=(1, 1), padding="SAME",
            dimension_numbers=("NCHW", "OIHW", "NCHW"))
        y = y * scale[:, 0][None, :, None, None] + shift[:, 0][None, :, None, None]
        out = jnp.maximum(y, 0.0)
    return out


if __name__ == "__main__":
    key = jax.random.PRNGKey(0)
    k_x, k_l1, k_l2 = jax.random.split(key, 3)

    N, Cin, Cout, H, W = 2, 4, 8, 16, 16
    x = jax.random.normal(k_x, (N, Cin, H, W), jnp.float32)

    params = (
        _init_layer_params(k_l1, Cin, Cout),     # conv1: Cin  -> Cout
        _init_layer_params(k_l2, Cout, Cout),    # conv2: Cout -> Cout
    )

    out = jax.block_until_ready(in_conv_forward(x, params))
    assert out.shape == (N, Cout, H, W), out.shape

    ref = _reference_forward(x, params)
    max_err = float(jnp.max(jnp.abs(out - ref)))
    assert jnp.allclose(out, ref, atol=1e-3, rtol=1e-3), f"mismatch, max_err={max_err}"

    print("KERNEL_OK")
</pallas_src>

<mosaic_0001>
module attributes {stable_mosaic.version = 11 : i64} {
  func.func @_double_conv_kernel(%arg0: i32, %arg1: memref<1x4x256xf32, #tpu.memory_space<vmem>>, %arg2: memref<8x36xf32, #tpu.memory_space<vmem>>, %arg3: memref<8x1xf32, #tpu.memory_space<vmem>>, %arg4: memref<8x1xf32, #tpu.memory_space<vmem>>, %arg5: memref<8x72xf32, #tpu.memory_space<vmem>>, %arg6: memref<8x1xf32, #tpu.memory_space<vmem>>, %arg7: memref<8x1xf32, #tpu.memory_space<vmem>>, %arg8: memref<1x8x256xf32, #tpu.memory_space<vmem>>, %arg9: memref<72x256xf32, #tpu.memory_space<vmem>>) attributes {dimension_semantics = [#tpu.dimension_semantics<parallel>], iteration_bounds = array<i64: 2>, scalar_prefetch = 0 : i64, scratch_operands = 1 : i64, tpu.core_type = #tpu.core_type<tc>, window_params = [{transform_indices = @transform_0, window_bounds = array<i64: 1, 4, 256>}, {pipeline_mode = #tpu.pipeline_mode<synchronous>, transform_indices = @transform_1, window_bounds = array<i64: 8, 36>}, {pipeline_mode = #tpu.pipeline_mode<synchronous>, transform_indices = @transform_2, window_bounds = array<i64: 8, 1>}, {pipeline_mode = #tpu.pipeline_mode<synchronous>, transform_indices = @transform_3, window_bounds = array<i64: 8, 1>}, {pipeline_mode = #tpu.pipeline_mode<synchronous>, transform_indices = @transform_4, window_bounds = array<i64: 8, 72>}, {pipeline_mode = #tpu.pipeline_mode<synchronous>, transform_indices = @transform_5, window_bounds = array<i64: 8, 1>}, {pipeline_mode = #tpu.pipeline_mode<synchronous>, transform_indices = @transform_6, window_bounds = array<i64: 8, 1>}, {transform_indices = @transform_7, window_bounds = array<i64: 1, 8, 256>}]} {
    %0 = tpu.iota {dimensions = array<i32: 1>} : vector<1x256xi32>
    %c15_i32 = arith.constant 15 : i32
    %1 = vector.broadcast %c15_i32 : i32 to vector<1x256xi32>
    %2 = arith.andi %0, %1 : vector<1x256xi32>
    %c1_i32 = arith.constant 1 : i32
    %3 = vector.broadcast %c1_i32 : i32 to vector<1x256xi32>
    %4 = arith.cmpi sge, %2, %3 : vector<1x256xi32>
    %c14_i32 = arith.constant 14 : i32
    %5 = vector.broadcast %c14_i32 : i32 to vector<1x256xi32>
    %6 = arith.cmpi sle, %2, %5 : vector<1x256xi32>
    %c16_i32 = arith.constant 16 : i32
    %7 = vector.broadcast %c16_i32 : i32 to vector<1x256xi32>
    %8 = arith.cmpi sge, %0, %7 : vector<1x256xi32>
    %c240_i32 = arith.constant 240 : i32
    %9 = vector.broadcast %c240_i32 : i32 to vector<1x256xi32>
    %10 = arith.cmpi slt, %0, %9 : vector<1x256xi32>
    %c0 = arith.constant 0 : index
    %c0_0 = arith.constant 0 : index
    %c0_1 = arith.constant 0 : index
    %11 = vector.load %arg1[%c0, %c0_0, %c0_1] : memref<1x4x256xf32, #tpu.memory_space<vmem>>, vector<1x4x256xf32>
    %12 = vector.shape_cast %11 : vector<1x4x256xf32> to vector<4x256xf32>
    %c0_2 = arith.constant 0 : index
    %c0_3 = arith.constant 0 : index
    %13 = vector.load %arg2[%c0_2, %c0_3] : memref<8x36xf32, #tpu.memory_space<vmem>>, vector<8x36xf32>
    %c0_4 = arith.constant 0 : index
    %c0_5 = arith.constant 0 : index
    %14 = vector.load %arg3[%c0_4, %c0_5] : memref<8x1xf32, #tpu.memory_space<vmem>>, vector<8x1xf32>
    %c0_6 = arith.constant 0 : index
    %c0_7 = arith.constant 0 : index
    %15 = vector.load %arg4[%c0_6, %c0_7] : memref<8x1xf32, #tpu.memory_space<vmem>>, vector<8x1xf32>
    %c17_i32 = arith.constant 17 : i32
    %16 = tpu.dynamic_rotate %12 by %c17_i32 dim 1 : vector<4x256xf32>, i32 -> vector<4x256xf32>
    %17 = arith.andi %8, %4 : vector<1x256xi1>
    %cst = arith.constant 0.000000e+00 : f32
    %18 = vector.shape_cast %17 : vector<1x256xi1> to vector<1x256xi1>
    %19 = vector.broadcast %18 : vector<1x256xi1> to vector<4x256xi1>
    %20 = vector.broadcast %cst : f32 to vector<4x256xf32>
    %21 = arith.select %19, %16, %20 : vector<4x256xi1>, vector<4x256xf32>
    %c0_8 = arith.constant 0 : index
    %c0_9 = arith.constant 0 : index
    %22 = vector.load %arg9[%c0_8, %c0_9] : memref<72x256xf32, #tpu.memory_space<vmem>>, vector<4x256xf32>
    tpu.vector_store %arg9[%c0_8, %c0_9], %21 {strides = array<i32>} : memref<72x256xf32, #tpu.memory_space<vmem>>, vector<4x256xf32>,
    %c16_i32_10 = arith.constant 16 : i32
    %23 = tpu.dynamic_rotate %12 by %c16_i32_10 dim 1 : vector<4x256xf32>, i32 -> vector<4x256xf32>
    %cst_11 = arith.constant 0.000000e+00 : f32
    %24 = vector.shape_cast %8 : vector<1x256xi1> to vector<1x256xi1>
    %25 = vector.broadcast %24 : vector<1x256xi1> to vector<4x256xi1>
    %26 = vector.broadcast %cst_11 : f32 to vector<4x256xf32>
    %27 = arith.select %25, %23, %26 : vector<4x256xi1>, vector<4x256xf32>
    %c4 = arith.constant 4 : index
    %c0_12 = arith.constant 0 : index
    %28 = vector.load %arg9[%c4, %c0_12] : memref<72x256xf32, #tpu.memory_space<vmem>>, vector<4x256xf32>
    tpu.vector_store %arg9[%c4, %c0_12], %27 {strides = array<i32>} : memref<72x256xf32, #tpu.memory_space<vmem>>, vector<4x256xf32>,
    %c15_i32_13 = arith.constant 15 : i32
    %29 = tpu.dynamic_rotate %12 by %c15_i32_13 dim 1 : vector<4x256xf32>, i32 -> vector<4x256xf32>
    %30 = arith.andi %8, %6 : vector<1x256xi1>
    %cst_14 = arith.constant 0.000000e+00 : f32
    %31 = vector.shape_cast %30 : vector<1x256xi1> to vector<1x256xi1>
    %32 = vector.broadcast %31 : vector<1x256xi1> to vector<4x256xi1>
    %33 = vector.broadcast %cst_14 : f32 to vector<4x256xf32>
    %34 = arith.select %32, %29, %33 : vector<4x256xi1>, vector<4x256xf32>
    %c8 = arith.constant 8 : index
    %c0_15 = arith.constant 0 : index
    %35 = vector.load %arg9[%c8, %c0_15] : memref<72x256xf32, #tpu.memory_space<vmem>>, vector<4x256xf32>
    tpu.vector_store %arg9[%c8, %c0_15], %34 {strides = array<i32>} : memref<72x256xf32, #tpu.memory_space<vmem>>, vector<4x256xf32>,
    %c1_i32_16 = arith.constant 1 : i32
    %36 = tpu.dynamic_rotate %12 by %c1_i32_16 dim 1 : vector<4x256xf32>, i32 -> vector<4x256xf32>
    %cst_17 = arith.constant 0.000000e+00 : f32
    %37 = vector.shape_cast %4 : vector<1x256xi1> to vector<1x256xi1>
    %38 = vector.broadcast %37 : vector<1x256xi1> to vector<4x256xi1>
    %39 = vector.broadcast %cst_17 : f32 to vector<4x256xf32>
    %40 = arith.select %38, %36, %39 : vector<4x256xi1>, vector<4x256xf32>
    %c12 = arith.constant 12 : index
    %c0_18 = arith.constant 0 : index
    %41 = vector.load %arg9[%c12, %c0_18] : memref<72x256xf32, #tpu.memory_space<vmem>>, vector<4x256xf32>
    tpu.vector_store %arg9[%c12, %c0_18], %40 {strides = array<i32>} : memref<72x256xf32, #tpu.memory_space<vmem>>, vector<4x256xf32>,
    %c16 = arith.constant 16 : index
    %c0_19 = arith.constant 0 : index
    %42 = vector.load %arg9[%c16, %c0_19] : memref<72x256xf32, #tpu.memory_space<vmem>>, vector<4x256xf32>
    tpu.vector_store %arg9[%c16, %c0_19], %12 {strides = array<i32>} : memref<72x256xf32, #tpu.memory_space<vmem>>, vector<4x256xf32>,
    %c255_i32 = arith.constant 255 : i32
    %43 = tpu.dynamic_rotate %12 by %c255_i32 dim 1 : vector<4x256xf32>, i32 -> vector<4x256xf32>
    %cst_20 = arith.constant 0.000000e+00 : f32
    %44 = vector.shape_cast %6 : vector<1x256xi1> to vector<1x256xi1>
    %45 = vector.broadcast %44 : vector<1x256xi1> to vector<4x256xi1>
    %46 = vector.broadcast %cst_20 : f32 to vector<4x256xf32>
    %47 = arith.select %45, %43, %46 : vector<4x256xi1>, vector<4x256xf32>
    %c20 = arith.constant 20 : index
    %c0_21 = arith.constant 0 : index
    %48 = vector.load %arg9[%c20, %c0_21] : memref<72x256xf32, #tpu.memory_space<vmem>>, vector<4x256xf32>
    tpu.vector_store %arg9[%c20, %c0_21], %47 {strides = array<i32>} : memref<72x256xf32, #tpu.memory_space<vmem>>, vector<4x256xf32>,
    %c241_i32 = arith.constant 241 : i32
    %49 = tpu.dynamic_rotate %12 by %c241_i32 dim 1 : vector<4x256xf32>, i32 -> vector<4x256xf32>
    %50 = arith.andi %10, %4 : vector<1x256xi1>
    %cst_22 = arith.constant 0.000000e+00 : f32
    %51 = vector.shape_cast %50 : vector<1x256xi1> to vector<1x256xi1>
    %52 = vector.broadcast %51 : vector<1x256xi1> to vector<4x256xi1>
    %53 = vector.broadcast %cst_22 : f32 to vector<4x256xf32>
    %54 = arith.select %52, %49, %53 : vector<4x256xi1>, vector<4x256xf32>
    %c24 = arith.constant 24 : index
    %c0_23 = arith.constant 0 : index
    %55 = vector.load %arg9[%c24, %c0_23] : memref<72x256xf32, #tpu.memory_space<vmem>>, vector<4x256xf32>
    tpu.vector_store %arg9[%c24, %c0_23], %54 {strides = array<i32>} : memref<72x256xf32, #tpu.memory_space<vmem>>, vector<4x256xf32>,
    %c240_i32_24 = arith.constant 240 : i32
    %56 = tpu.dynamic_rotate %12 by %c240_i32_24 dim 1 : vector<4x256xf32>, i32 -> vector<4x256xf32>
    %cst_25 = arith.constant 0.000000e+00 : f32
    %57 = vector.shape_cast %10 : vector<1x256xi1> to vector<1x256xi1>
    %58 = vector.broadcast %57 : vector<1x256xi1> to vector<4x256xi1>
    %59 = vector.broadcast %cst_25 : f32 to vector<4x256xf32>
    %60 = arith.select %58, %56, %59 : vector<4x256xi1>, vector<4x256xf32>
    %c28 = arith.constant 28 : index
    %c0_26 = arith.constant 0 : index
    %61 = vector.load %arg9[%c28, %c0_26] : memref<72x256xf32, #tpu.memory_space<vmem>>, vector<4x256xf32>
    tpu.vector_store %arg9[%c28, %c0_26], %60 {strides = array<i32>} : memref<72x256xf32, #tpu.memory_space<vmem>>, vector<4x256xf32>,
    %c239_i32 = arith.constant 239 : i32
    %62 = tpu.dynamic_rotate %12 by %c239_i32 dim 1 : vector<4x256xf32>, i32 -> vector<4x256xf32>
    %63 = arith.andi %10, %6 : vector<1x256xi1>
    %cst_27 = arith.constant 0.000000e+00 : f32
    %64 = vector.shape_cast %63 : vector<1x256xi1> to vector<1x256xi1>
    %65 = vector.broadcast %64 : vector<1x256xi1> to vector<4x256xi1>
    %66 = vector.broadcast %cst_27 : f32 to vector<4x256xf32>
    %67 = arith.select %65, %62, %66 : vector<4x256xi1>, vector<4x256xf32>
    %c32 = arith.constant 32 : index
    %c0_28 = arith.constant 0 : index
    %68 = vector.load %arg9[%c32, %c0_28] : memref<72x256xf32, #tpu.memory_space<vmem>>, vector<4x256xf32>
    tpu.vector_store %arg9[%c32, %c0_28], %67 {strides = array<i32>} : memref<72x256xf32, #tpu.memory_space<vmem>>, vector<4x256xf32>,
    %c0_29 = arith.constant 0 : index
    %c0_30 = arith.constant 0 : index
    %69 = vector.load %arg9[%c0_29, %c0_30] : memref<72x256xf32, #tpu.memory_space<vmem>>, vector<36x256xf32>
    %cst_31 = arith.constant dense<0.000000e+00> : vector<8x256xf32>
    %70 = tpu.matmul %13, %69, %cst_31 {dimension_numbers = #tpu.dot_dimension_numbers<[1], [0], [0], [1], [0, 0, 1, 1], [], []>} : vector<8x36xf32>, vector<36x256xf32>, vector<8x256xf32> -> vector<8x256xf32>
    %71 = vector.broadcast %14 : vector<8x1xf32> to vector<8x256xf32>
    %72 = arith.mulf %70, %71 : vector<8x256xf32>
    %73 = vector.broadcast %15 : vector<8x1xf32> to vector<8x256xf32>
    %74 = arith.addf %72, %73 : vector<8x256xf32>
    %cst_32 = arith.constant 0.000000e+00 : f32
    %75 = vector.broadcast %cst_32 : f32 to vector<8x256xf32>
    %76 = arith.maximumf %74, %75 : vector<8x256xf32>
    %c0_33 = arith.constant 0 : index
    %c0_34 = arith.constant 0 : index
    %77 = vector.load %arg5[%c0_33, %c0_34] : memref<8x72xf32, #tpu.memory_space<vmem>>, vector<8x72xf32>
    %c0_35 = arith.constant 0 : index
    %c0_36 = arith.constant 0 : index
    %78 = vector.load %arg6[%c0_35, %c0_36] : memref<8x1xf32, #tpu.memory_space<vmem>>, vector<8x1xf32>
    %c0_37 = arith.constant 0 : index
    %c0_38 = arith.constant 0 : index
    %79 = vector.load %arg7[%c0_37, %c0_38] : memref<8x1xf32, #tpu.memory_space<vmem>>, vector<8x1xf32>
    %c17_i32_39 = arith.constant 17 : i32
    %80 = tpu.dynamic_rotate %76 by %c17_i32_39 dim 1 : vector<8x256xf32>, i32 -> vector<8x256xf32>
    %81 = arith.andi %8, %4 : vector<1x256xi1>
    %cst_40 = arith.constant 0.000000e+00 : f32
    %82 = vector.shape_cast %81 : vector<1x256xi1> to vector<1x256xi1>
    %83 = vector.broadcast %82 : vector<1x256xi1> to vector<8x256xi1>
    %84 = vector.broadcast %cst_40 : f32 to vector<8x256xf32>
    %85 = arith.select %83, %80, %84 : vector<8x256xi1>, vector<8x256xf32>
    %c0_41 = arith.constant 0 : index
    %c0_42 = arith.constant 0 : index
    %86 = vector.load %arg9[%c0_41, %c0_42] : memref<72x256xf32, #tpu.memory_space<vmem>>, vector<8x256xf32>
    tpu.vector_store %arg9[%c0_41, %c0_42], %85 {strides = array<i32>} : memref<72x256xf32, #tpu.memory_space<vmem>>, vector<8x256xf32>,
    %c16_i32_43 = arith.constant 16 : i32
    %87 = tpu.dynamic_rotate %76 by %c16_i32_43 dim 1 : vector<8x256xf32>, i32 -> vector<8x256xf32>
    %cst_44 = arith.constant 0.000000e+00 : f32
    %88 = vector.shape_cast %8 : vector<1x256xi1> to vector<1x256xi1>
    %89 = vector.broadcast %88 : vector<1x256xi1> to vector<8x256xi1>
    %90 = vector.broadcast %cst_44 : f32 to vector<8x256xf32>
    %91 = arith.select %89, %87, %90 : vector<8x256xi1>, vector<8x256xf32>
    %c8_45 = arith.constant 8 : index
    %c0_46 = arith.constant 0 : index
    %92 = vector.load %arg9[%c8_45, %c0_46] : memref<72x256xf32, #tpu.memory_space<vmem>>, vector<8x256xf32>
    tpu.vector_store %arg9[%c8_45, %c0_46], %91 {strides = array<i32>} : memref<72x256xf32, #tpu.memory_space<vmem>>, vector<8x256xf32>,
    %c15_i32_47 = arith.constant 15 : i32
    %93 = tpu.dynamic_rotate %76 by %c15_i32_47 dim 1 : vector<8x256xf32>, i32 -> vector<8x256xf32>
    %94 = arith.andi %8, %6 : vector<1x256xi1>
    %cst_48 = arith.constant 0.000000e+00 : f32
    %95 = vector.shape_cast %94 : vector<1x256xi1> to vector<1x256xi1>
    %96 = vector.broadcast %95 : vector<1x256xi1> to vector<8x256xi1>
    %97 = vector.broadcast %cst_48 : f32 to vector<8x256xf32>
    %98 = arith.select %96, %93, %97 : vector<8x256xi1>, vector<8x256xf32>
    %c16_49 = arith.constant 16 : index
    %c0_50 = arith.constant 0 : index
    %99 = vector.load %arg9[%c16_49, %c0_50] : memref<72x256xf32, #tpu.memory_space<vmem>>, vector<8x256xf32>
    tpu.vector_store %arg9[%c16_49, %c0_50], %98 {strides = array<i32>} : memref<72x256xf32, #tpu.memory_space<vmem>>, vector<8x256xf32>,
    %c1_i32_51 = arith.constant 1 : i32
    %100 = tpu.dynamic_rotate %76 by %c1_i32_51 dim 1 : vector<8x256xf32>, i32 -> vector<8x256xf32>
    %cst_52 = arith.constant 0.000000e+00 : f32
    %101 = vector.shape_cast %4 : vector<1x256xi1> to vector<1x256xi1>
    %102 = vector.broadcast %101 : vector<1x256xi1> to vector<8x256xi1>
    %103 = vector.broadcast %cst_52 : f32 to vector<8x256xf32>
    %104 = arith.select %102, %100, %103 : vector<8x256xi1>, vector<8x256xf32>
    %c24_53 = arith.constant 24 : index
    %c0_54 = arith.constant 0 : index
    %105 = vector.load %arg9[%c24_53, %c0_54] : memref<72x256xf32, #tpu.memory_space<vmem>>, vector<8x256xf32>
    tpu.vector_store %arg9[%c24_53, %c0_54], %104 {strides = array<i32>} : memref<72x256xf32, #tpu.memory_space<vmem>>, vector<8x256xf32>,
    %c32_55 = arith.constant 32 : index
    %c0_56 = arith.constant 0 : index
    %106 = vector.load %arg9[%c32_55, %c0_56] : memref<72x256xf32, #tpu.memory_space<vmem>>, vector<8x256xf32>
    tpu.vector_store %arg9[%c32_55, %c0_56], %76 {strides = array<i32>} : memref<72x256xf32, #tpu.memory_space<vmem>>, vector<8x256xf32>,
    %c255_i32_57 = arith.constant 255 : i32
    %107 = tpu.dynamic_rotate %76 by %c255_i32_57 dim 1 : vector<8x256xf32>, i32 -> vector<8x256xf32>
    %cst_58 = arith.constant 0.000000e+00 : f32
    %108 = vector.shape_cast %6 : vector<1x256xi1> to vector<1x256xi1>
    %109 = vector.broadcast %108 : vector<1x256xi1> to vector<8x256xi1>
    %110 = vector.broadcast %cst_58 : f32 to vector<8x256xf32>
    %111 = arith.select %109, %107, %110 : vector<8x256xi1>, vector<8x256xf32>
    %c40 = arith.constant 40 : index
    %c0_59 = arith.constant 0 : index
    %112 = vector.load %arg9[%c40, %c0_59] : memref<72x256xf32, #tpu.memory_space<vmem>>, vector<8x256xf32>
    tpu.vector_store %arg9[%c40, %c0_59], %111 {strides = array<i32>} : memref<72x256xf32, #tpu.memory_space<vmem>>, vector<8x256xf32>,
    %c241_i32_60 = arith.constant 241 : i32
    %113 = tpu.dynamic_rotate %76 by %c241_i32_60 dim 1 : vector<8x256xf32>, i32 -> vector<8x256xf32>
    %114 = arith.andi %10, %4 : vector<1x256xi1>
    %cst_61 = arith.constant 0.000000e+00 : f32
    %115 = vector.shape_cast %114 : vector<1x256xi1> to vector<1x256xi1>
    %116 = vector.broadcast %115 : vector<1x256xi1> to vector<8x256xi1>
    %117 = vector.broadcast %cst_61 : f32 to vector<8x256xf32>
    %118 = arith.select %116, %113, %117 : vector<8x256xi1>, vector<8x256xf32>
    %c48 = arith.constant 48 : index
    %c0_62 = arith.constant 0 : index
    %119 = vector.load %arg9[%c48, %c0_62] : memref<72x256xf32, #tpu.memory_space<vmem>>, vector<8x256xf32>
    tpu.vector_store %arg9[%c48, %c0_62], %118 {strides = array<i32>} : memref<72x256xf32, #tpu.memory_space<vmem>>, vector<8x256xf32>,
    %c240_i32_63 = arith.constant 240 : i32
    %120 = tpu.dynamic_rotate %76 by %c240_i32_63 dim 1 : vector<8x256xf32>, i32 -> vector<8x256xf32>
    %cst_64 = arith.constant 0.000000e+00 : f32
    %121 = vector.shape_cast %10 : vector<1x256xi1> to vector<1x256xi1>
    %122 = vector.broadcast %121 : vector<1x256xi1> to vector<8x256xi1>
    %123 = vector.broadcast %cst_64 : f32 to vector<8x256xf32>
    %124 = arith.select %122, %120, %123 : vector<8x256xi1>, vector<8x256xf32>
    %c56 = arith.constant 56 : index
    %c0_65 = arith.constant 0 : index
    %125 = vector.load %arg9[%c56, %c0_65] : memref<72x256xf32, #tpu.memory_space<vmem>>, vector<8x256xf32>
    tpu.vector_store %arg9[%c56, %c0_65], %124 {strides = array<i32>} : memref<72x256xf32, #tpu.memory_space<vmem>>, vector<8x256xf32>,
    %c239_i32_66 = arith.constant 239 : i32
    %126 = tpu.dynamic_rotate %76 by %c239_i32_66 dim 1 : vector<8x256xf32>, i32 -> vector<8x256xf32>
    %127 = arith.andi %10, %6 : vector<1x256xi1>
    %cst_67 = arith.constant 0.000000e+00 : f32
    %128 = vector.shape_cast %127 : vector<1x256xi1> to vector<1x256xi1>
    %129 = vector.broadcast %128 : vector<1x256xi1> to vector<8x256xi1>
    %130 = vector.broadcast %cst_67 : f32 to vector<8x256xf32>
    %131 = arith.select %129, %126, %130 : vector<8x256xi1>, vector<8x256xf32>
    %c64 = arith.constant 64 : index
    %c0_68 = arith.constant 0 : index
    %132 = vector.load %arg9[%c64, %c0_68] : memref<72x256xf32, #tpu.memory_space<vmem>>, vector<8x256xf32>
    tpu.vector_store %arg9[%c64, %c0_68], %131 {strides = array<i32>} : memref<72x256xf32, #tpu.memory_space<vmem>>, vector<8x256xf32>,
    %c0_69 = arith.constant 0 : index
    %c0_70 = arith.constant 0 : index
    %133 = vector.load %arg9[%c0_69, %c0_70] : memref<72x256xf32, #tpu.memory_space<vmem>>, vector<72x256xf32>
    %cst_71 = arith.constant dense<0.000000e+00> : vector<8x256xf32>
    %134 = tpu.matmul %77, %133, %cst_71 {dimension_numbers = #tpu.dot_dimension_numbers<[1], [0], [0], [1], [0, 0, 1, 1], [], []>} : vector<8x72xf32>, vector<72x256xf32>, vector<8x256xf32> -> vector<8x256xf32>
    %135 = vector.broadcast %78 : vector<8x1xf32> to vector<8x256xf32>
    %136 = arith.mulf %134, %135 : vector<8x256xf32>
    %137 = vector.broadcast %79 : vector<8x1xf32> to vector<8x256xf32>
    %138 = arith.addf %136, %137 : vector<8x256xf32>
    %cst_72 = arith.constant 0.000000e+00 : f32
    %139 = vector.broadcast %cst_72 : f32 to vector<8x256xf32>
    %140 = arith.maximumf %138, %139 : vector<8x256xf32>
    %c0_73 = arith.constant 0 : index
    %c0_74 = arith.constant 0 : index
    %c0_75 = arith.constant 0 : index
    %141 = vector.load %arg8[%c0_73, %c0_74, %c0_75] : memref<1x8x256xf32, #tpu.memory_space<vmem>>, vector<1x8x256xf32>
    %142 = vector.shape_cast %141 : vector<1x8x256xf32> to vector<8x256xf32>
    %143 = vector.shape_cast %140 : vector<8x256xf32> to vector<1x8x256xf32>
    tpu.vector_store %arg8[%c0_73, %c0_74, %c0_75], %143 {strides = array<i32>} : memref<1x8x256xf32, #tpu.memory_space<vmem>>, vector<1x8x256xf32>,
    return
  }
  func.func @transform_0(%arg0: i32) -> (i32, i32, i32) {
    %c0_i32 = arith.constant 0 : i32
    %c0_i32_0 = arith.constant 0 : i32
    %c0_i32_1 = arith.constant 0 : i32
    return %arg0, %c0_i32, %c0_i32_0 : i32, i32, i32
  }
  func.func @transform_1(%arg0: i32) -> (i32, i32) {
    %c0_i32 = arith.constant 0 : i32
    %c0_i32_0 = arith.constant 0 : i32
    %c0_i32_1 = arith.constant 0 : i32
    return %c0_i32, %c0_i32_0 : i32, i32
  }
  func.func @transform_2(%arg0: i32) -> (i32, i32) {
    %c0_i32 = arith.constant 0 : i32
    %c0_i32_0 = arith.constant 0 : i32
    %c0_i32_1 = arith.constant 0 : i32
    return %c0_i32, %c0_i32_0 : i32, i32
  }
  func.func @transform_3(%arg0: i32) -> (i32, i32) {
    %c0_i32 = arith.constant 0 : i32
    %c0_i32_0 = arith.constant 0 : i32
    %c0_i32_1 = arith.constant 0 : i32
    return %c0_i32, %c0_i32_0 : i32, i32
  }
  func.func @transform_4(%arg0: i32) -> (i32, i32) {
    %c0_i32 = arith.constant 0 : i32
    %c0_i32_0 = arith.constant 0 : i32
    %c0_i32_1 = arith.constant 0 : i32
    return %c0_i32, %c0_i32_0 : i32, i32
  }
  func.func @transform_5(%arg0: i32) -> (i32, i32) {
    %c0_i32 = arith.constant 0 : i32
    %c0_i32_0 = arith.constant 0 : i32
    %c0_i32_1 = arith.constant 0 : i32
    return %c0_i32, %c0_i32_0 : i32, i32
  }
  func.func @transform_6(%arg0: i32) -> (i32, i32) {
    %c0_i32 = arith.constant 0 : i32
    %c0_i32_0 = arith.constant 0 : i32
    %c0_i32_1 = arith.constant 0 : i32
    return %c0_i32, %c0_i32_0 : i32, i32
  }
  func.func @transform_7(%arg0: i32) -> (i32, i32, i32) {
    %c0_i32 = arith.constant 0 : i32
    %c0_i32_0 = arith.constant 0 : i32
    %c0_i32_1 = arith.constant 0 : i32
    return %arg0, %c0_i32, %c0_i32_0 : i32, i32, i32
  }
}

</mosaic_0001>

<bundles_post_ra>
// kernel: double_conv.1
= control target key start
LH: loop header
LB: loop body
LE: loop exit
PB: predicated region body
PF: predicated region fallthrough
CT: control target
= control target key end

     0   :  { %s922_s24 = smov 0   ;;  %s1192_s0 = inlined_call_operand.vmem [shape: f32[2,4,256], index: 0, kind: input, shape index: {}]   ;;  %s1193_s1 = inlined_call_operand.vmem [shape: f32[8,36], index: 1, kind: input, shape index: {}]   ;;  %s1194_s2 = inlined_call_operand.vmem [shape: f32[8,1], index: 2, kind: input, shape index: {}]   ;;  %s1195_s3 = inlined_call_operand.vmem [shape: f32[8,1], index: 3, kind: input, shape index: {}]   ;;  %s1196_s4 = inlined_call_operand.vmem [shape: f32[8,72], index: 4, kind: input, shape index: {}]   ;;  %s1197_s5 = inlined_call_operand.vmem [shape: f32[8,1], index: 5, kind: input, shape index: {}]   ;;  %s1198_s6 = inlined_call_operand.vmem [shape: f32[8,1], index: 6, kind: input, shape index: {}]   ;;  %s1199_s7 = inlined_call_operand.vmem [shape: f32[2,8,256], index: 7, kind: output, shape index: {}]  }
   0x1 LB: > { %s812_s25 = sadd.s32 4294967295, %s870_s24   ;;  %p816_p0 = scmp.ge.s32.totalorder %s870_s24, 1  ;;  %s870_s24 = sphi %s922_s24, %s17_s24  }
   0x2   : > { %p237_p1 = scmp.lt.s32.totalorder %s870_s24, 3 }
   0x4   : > { %p238_p2 = pnand %p816_p0, %p237_p1 }
   0x5   : > { %p269_p3 = scmp.lt.s32.totalorder (!%p238_p2), %s812_s25, 1  ;;  %s872_s30 = smov (!%p238_p2), 111  }
   0x6   : > { %241 = sbr.rel (%p238_p2) target bundleno = 719 (0x2cf), region = 48  ;;  %s873_s8 = smov (!%p238_p2), 112  }
   0x7   : > { %s874_s9 = smov (!%p238_p2), 127   ;;  %s875_s10 = smov (!%p238_p2), 113  }
   0x8   : > { %s876_s11 = smov (!%p238_p2), 1   ;;  %s877_s12 = smov (!%p238_p2), 15  }
   0x9   : > { %s878_s13 = smov (!%p238_p2), 16   ;;  %s880_s14 = smov (!%p238_p2), 17  }
   0xb   : > { %s1226_s25 = smov (!%p269_p3, %s812_s25), 1  ;;  %v879_v2 = vmov 0.0   ;;  %v881_v3 = vmov 0   ;;  %v294_v4 = vld [vmem:[%s1194_s2] sm:$0xff]  ;;  %v279_v6 = vlaneseq  ;;  %vm467_vm11 = vcmask 1043456  }
   0xc   : > { %s827_s26 = sshll.u32 %s1226_s25, 3  ;;  %538 = vmatprep.mubr.f32.mxu0 %v879_v2  ;;  %732 = vmatprep.mubr.f32.mxu1 %v879_v2  ;;  %v295_v5 = vld [vmem:[%s1195_s3] sm:$0xff] }
   0xd   : > { %s273_s29 = scalar_lea.vmem %s1192_s0, %s827_s26  ;;  %847 = vset.pattern.permute.xlu0 %v881_v3  ;;  %848 = vset.pattern.permute.xlu1 %v881_v3  ;;  %v958_v7 = vand.u32 127, %v279_v6 }
   0xe   : > { %v292_v0 = vld [vmem:[%s273_s29] sm:$0xff]  ;;  %s828_s29 = sshll.u32 %s1226_s25, 4 }
   0xf   : > { %436 = vrot.lane.b32.xlu1 %v292_v0, %s872_s30  ;;  %375 = vst [vmem:[#allocation2 + $0x20] sm:$0xf] %v292_v0  ;;  %415 = vrot.lane.b32.xlu0 %v292_v0, %s873_s8  ;;  %v297_v1 = vcombine.high %v292_v0, %v292_v0  ;;  %v961_v8 = vadd.s32 128, %v958_v7  ;;  %v282_v10 = vand.u32 15, %v958_v7  ;;  %vm440_vm2 = vcmp.lt.s32.totalorder %v958_v7, 111 }
  0x10   : > { %vm381_vm5 = vcmp.lt.s32.totalorder %v958_v7, 127  ;;  %vm419_vm6 = vcmp.lt.s32.totalorder %v958_v7, 112  ;;  %vm402_vm8 = vcmp.lt.s32.totalorder %v958_v7, 113  ;;  %vm1201_vm12 = vcmp.lt.s32.totalorder %v958_v7, 1 }
  0x11   : > { %376 = vst [vmem:[#allocation2 + $0x8] sm:$0xf] %v297_v1  ;;  %v283_v9 = vand.u32 15, %v961_v8  ;;  %vm291_vm1 = vcmp.lt.s32.totalorder %v961_v8, 240  ;;  %vm971_vm3 = vcmp.le.s32.totalorder %v282_v10, 14  ;;  %vm1012_vm9 = vcmp.ge.s32.totalorder %v282_v10, 1 }
  0x12   : > { %vm1202_vm13 = vcmp.ge.s32.totalorder %v958_v7, 16  ;;  %vm1200_vm14 = vcmp.lt.s32.totalorder %v958_v7, 15 }
  0x13   : > { %377 = vrot.lane.b32.xlu0 %v292_v0, %s874_s9  ;;  %438 = vrot.lane.b32.xlu1 %v297_v1, %s872_s30  ;;  %vm965_vm0 = vcmp.le.s32.totalorder %v283_v9, 14  ;;  %vm993_vm7 = vcmp.ge.s32.totalorder %v283_v9, 1  ;;  %vm1047_vm15 = vmand %vm1202_vm13, %vm971_vm3 }
  0x14   : > { %vm979_vm4 = vmand %vm291_vm1, %vm965_vm0 }
  0x15   : > { %vm1020_vm10 = vmand %vm291_vm1, %vm993_vm7 }
  0x17   : > { %379 = vrot.lane.b32.xlu1 %v297_v1, %s874_s9  ;;  %417 = vrot.lane.b32.xlu0 %v297_v1, %s873_s8 }
  0x1b   : > { %400 = vrot.lane.b32.xlu1 %v297_v1, %s875_s10  ;;  %398 = vrot.lane.b32.xlu0 %v292_v0, %s875_s10 }
  0x1f   : > { %356 = vrot.lane.b32.xlu1 %v297_v1, %s876_s11  ;;  %354 = vrot.lane.b32.xlu0 %v292_v0, %s876_s11 }
  0x23   : > { %339 = vrot.lane.b32.xlu1 %v297_v1, %s877_s12  ;;  %337 = vrot.lane.b32.xlu0 %v292_v0, %s877_s12 }
  0x27   : > { %318 = vrot.lane.b32.xlu1 %v297_v1, %s878_s13  ;;  %316 = vrot.lane.b32.xlu0 %v292_v0, %s878_s13 }
  0x2b   : > { %301 = vrot.lane.b32.xlu1 %v297_v1, %s880_s14  ;;  %299 = vrot.lane.b32.xlu0 %v292_v0, %s880_s14 }
  0x2f   : > { %547 = vperm.xlu0 %847, %v294_v4   ;;  %554 = vperm.xlu1 %848, %v295_v5  }
  0x81   : > { %v437_v11 = vpop.permute.xlu1 %436  ;;  %v416_v12 = vpop.permute.xlu0 %415 }
  0x85   : > { %v378_v16 = vpop.permute.xlu0 %377  ;;  %v439_v17 = vpop.permute.xlu1 %438 }
  0x86   : > { %v441_v18 = vsel %vm440_vm2, %v437_v11, %v439_v17  ;;  %v442_v19 = vsel %vm440_vm2, %v439_v17, %v437_v11 }
  0x87   : > { %v449_v20 = vsel %vm971_vm3, %v441_v18, 0.0  ;;  %v450_v21 = vsel %vm979_vm4, %v442_v19, 0.0 }
  0x88   : > { %451 = vst [vmem:[#allocation2 + $0x88] sm:$0xf] %v449_v20  ;;  %452 = vst [vmem:[#allocation2 + $0x40] sm:$0xf] %v450_v21 }
  0x89   : > { %v380_v22 = vpop.permute.xlu1 %379  ;;  %v418_v23 = vpop.permute.xlu0 %417 }
  0x8a   : > { %v382_v25 = vsel %vm381_vm5, %v378_v16, %v380_v22  ;;  %v383_v26 = vsel %vm381_vm5, %v380_v22, %v378_v16  ;;  %v420_v27 = vsel %vm419_vm6, %v416_v12, %v418_v23  ;;  %v421_v28 = vsel %vm419_vm6, %v418_v23, %v416_v12 }
  0x8b   : > { %v388_v29 = vsel %vm971_vm3, %v382_v25, 0.0  ;;  %v389_v30 = vsel %vm965_vm0, %v383_v26, 0.0  ;;  %v427_v31 = vsel %vm291_vm1, %v421_v28, 0.0  ;;  %v430_v32 = vrot.slane %v420_v27, 4  ;;  %v293_v25 = vld [vmem:[%s1193_s1] sm:$0xff] }
  0x8c   : > { %v392_v33 = vrot.slane %v388_v29, 4  ;;  %v393_v34 = vrot.slane %v389_v30, 4  ;;  %v431_v35 = vrot.slane %v427_v31, 4 }
  0x8d   : > { %434 = vst [vmem:[#allocation2 + $0x70] sm:$0xf0] %v430_v32  ;;  %v401_v38 = vpop.permute.xlu1 %400  ;;  %v399_v39 = vpop.permute.xlu0 %398 }
  0x8e   : > { %396 = vst [vmem:[#allocation2 + $0x20] sm:$0xf0] %v392_v33  ;;  %397 = vst [vmem:[#allocation2 + $0x8] sm:$0xf0] %v393_v34  ;;  %v403_v40 = vsel %vm402_vm8, %v399_v39, %v401_v38  ;;  %v404_v41 = vsel %vm402_vm8, %v401_v38, %v399_v39  ;;  %v562_v38 = vld [vmem:[%s1197_s5] sm:$0xff] }
  0x8f   : > { %435 = vst [vmem:[#allocation2 + $0x80] sm:$0xf0] %v431_v35  ;;  %v411_v42 = vsel %vm1012_vm9, %v403_v40, 0.0  ;;  %v412_v43 = vsel %vm1020_vm10, %v404_v41, 0.0  ;;  %v462_v44 = vld [vmem:[#allocation2 + $0x40] sm:$0xf] }
  0x90   : > { %v461_v45 = vld [vmem:[#allocation2 + $0x88] sm:$0xf]  ;;  %413 = vst [vmem:[#allocation2 + $0x70] sm:$0xf] %v411_v42  ;;  %414 = vst [vmem:[#allocation2 + $0x80] sm:$0xf] %v412_v43  ;;  %821 = vmatprep.subr.msk.mxu0 %vm467_vm11, %v462_v44 }
  0x91   : > { %822 = vmatpush1.msk.msra.mxu0 %vm467_vm11, %v461_v45  ;;  %v357_v46 = vpop.permute.xlu1 %356  ;;  %v355_v47 = vpop.permute.xlu0 %354  ;;  %vm320_vm11 = vcmp.lt.s32.totalorder %v958_v7, 16  ;;  %v563_v39 = vld [vmem:[%s1198_s6] sm:$0xff] }
  0x92   : > { %v359_v48 = vsel %vm1201_vm12, %v355_v47, %v357_v46  ;;  %v360_v49 = vsel %vm1201_vm12, %v357_v46, %v355_v47  ;;  %vm1071_vm12 = vmand %vm1202_vm13, %vm1012_vm9 }
  0x93   : > { %v365_v50 = vsel %vm1012_vm9, %v360_v49, 0.0  ;;  %v366_v51 = vsel %vm993_vm7, %v359_v48, 0.0 }
  0x94   : > { %v369_v52 = vrot.slane %v365_v50, 4  ;;  %v370_v53 = vrot.slane %v366_v51, 4 }
  0x95   : > { %v340_v55 = vpop.permute.xlu1 %339  ;;  %v338_v56 = vpop.permute.xlu0 %337  ;;  %v458_v1 = vld [vmem:[#allocation2 + $0x8] sm:$0xff]  ;;  %v457_v4 = vld [vmem:[#allocation2 + $0x20] sm:$0xff] }
  0x96   : > { %373 = vst [vmem:[#allocation2 + $0x78] sm:$0xf0] %v369_v52  ;;  %374 = vst [vmem:[#allocation2 + $0x58] sm:$0xf0] %v370_v53  ;;  %v342_v57 = vsel %vm1200_vm14, %v338_v56, %v340_v55  ;;  %v343_v58 = vsel %vm1200_vm14, %v340_v55, %v338_v56  ;;  %vm303_vm14 = vcmp.lt.s32.totalorder %v958_v7, 17 }
  0x97   : > { %v350_v59 = vsel %vm1047_vm15, %v343_v58, 0.0  ;;  %v351_v60 = vsel %vm965_vm0, %v342_v57, 0.0  ;;  %v460_v61 = vld [vmem:[#allocation2 + $0x80] sm:$0xff]  ;;  %v459_v62 = vld [vmem:[#allocation2 + $0x70] sm:$0xff] }
  0x98   : > { %352 = vst [vmem:[#allocation2 + $0x78] sm:$0xf] %v350_v59  ;;  %353 = vst [vmem:[#allocation2 + $0x58] sm:$0xf] %v351_v60  ;;  %498 = vmatprep.subr.mxu0 %v460_v61 }
  0x99   : > { %v319_v63 = vpop.permute.xlu1 %318  ;;  %499 = vmatpush1.msra.mxu0 %v459_v62  ;;  %v317_v0 = vpop.permute.xlu0 %316 }
  0x9a   : > { %v321_v2 = vsel %vm320_vm11, %v317_v0, %v319_v63  ;;  %v322_v3 = vsel %vm320_vm11, %v319_v63, %v317_v0  ;;  %500 = vmatprep.subr.mxu0 %v458_v1 }
  0x9b   : > { %v327_v5 = vsel %vm1202_vm13, %v322_v3, 0.0  ;;  %v332_v6 = vrot.slane %v321_v2, 4  ;;  %501 = vmatpush1.msra.mxu0 %v457_v4  ;;  %vm463_vm13 = vcmask 293888  }
  0x9c   : > { %v331_v9 = vrot.slane %v327_v5, 4 }
  0x9d   : > { %336 = vst [vmem:[#allocation2 + $0x38] sm:$0xf0] %v332_v6  ;;  %v302_v11 = vpop.permute.xlu1 %301  ;;  %v300_v12 = vpop.permute.xlu0 %299 }
  0x9e   : > { %335 = vst [vmem:[#allocation2] sm:$0xf0] %v331_v9  ;;  %v304_v16 = vsel %vm303_vm14, %v300_v12, %v302_v11  ;;  %v305_v17 = vsel %vm303_vm14, %v302_v11, %v300_v12  ;;  %v561_v12 = vld [vmem:[%s1196_s4] sm:$0xff] }
  0x9f   : > { %v312_v18 = vsel %vm1071_vm12, %v305_v17, 0.0  ;;  %v313_v19 = vsel %vm993_vm7, %v304_v16, 0.0  ;;  %v456_v20 = vld [vmem:[#allocation2 + $0x58] sm:$0xff] }
  0xa0   : > { %v455_v21 = vld [vmem:[#allocation2 + $0x78] sm:$0xff]  ;;  %314 = vst [vmem:[#allocation2] sm:$0xf] %v312_v18  ;;  %315 = vst [vmem:[#allocation2 + $0x38] sm:$0xf] %v313_v19  ;;  %502 = vmatprep.subr.mxu0 %v456_v20 }
  0xa1   : > { %503 = vmatpush1.msra.mxu0 %v455_v21 }
  0xa7   : > { %v454_v22 = vld [vmem:[#allocation2 + $0x38] sm:$0xff]  ;;  %v453_v23 = vld [vmem:[#allocation2] sm:$0xff] }
  0xa8   : > { %504 = vmatprep.subr.mxu0 %v454_v22 }
  0xa9   : > { %505 = vmatpush1.msra.mxu0 %v453_v23 }
  0xaa   : > { %823 = vmatmul.mubr.msk.f32.vlgmr.msra.gmra.mxu0 %vm463_vm13, %v293_v25  ;;  %v548_v26 = vpop.permute.xlu0 %547  ;;  %v555_v28 = vpop.permute.xlu1 %554 }
 0x16a   : > { %v540_v27 = vpop.f32.mrf.mxu0 }
 0x16b   : > { %v550_v29 = vmul.f32 %v548_v26, %v540_v27 }
 0x16c   : > { %v542_v30 = vpop.f32.mrf.mxu0 }
 0x16d   : > { %v557_v31 = vadd.f32 %v555_v28, %v550_v29  ;;  %v551_v32 = vmul.f32 %v548_v26, %v542_v30 }
 0x16f   : > { %v559_v33 = vmax.f32 %v557_v31, 0.0  ;;  %v558_v34 = vadd.f32 %v555_v28, %v551_v32 }
 0x171   : > { %604 = vst [vmem:[#allocation2 + $0x88] sm:$0xff] %v559_v33  ;;  %v560_v35 = vmax.f32 %v558_v34, 0.0  ;;  %636 = vrot.lane.b32.xlu1 %v559_v33, %s872_s30 }
 0x173   : > { %605 = vst [vmem:[#allocation2 + $0x40] sm:$0xff] %v560_v35  ;;  %638 = vrot.lane.b32.xlu0 %v560_v35, %s872_s30 }
 0x175   : > { %626 = vrot.lane.b32.xlu1 %v559_v33, %s873_s8 }
 0x177   : > { %628 = vrot.lane.b32.xlu0 %v560_v35, %s873_s8 }
 0x179   : > { %616 = vrot.lane.b32.xlu1 %v559_v33, %s875_s10 }
 0x17b   : > { %618 = vrot.lane.b32.xlu0 %v560_v35, %s875_s10 }
 0x17d   : > { %606 = vrot.lane.b32.xlu1 %v559_v33, %s874_s9 }
 0x17f   : > { %608 = vrot.lane.b32.xlu0 %v560_v35, %s874_s9  ;;  %s278_s9 = scalar_lea.vmem %s1199_s7, %s828_s29 }
 0x181   : > { %594 = vrot.lane.b32.xlu1 %v559_v33, %s876_s11 }
 0x183   : > { %596 = vrot.lane.b32.xlu0 %v560_v35, %s876_s11 }
 0x185   : > { %584 = vrot.lane.b32.xlu1 %v559_v33, %s877_s12 }
 0x187   : > { %586 = vrot.lane.b32.xlu0 %v560_v35, %s877_s12 }
 0x189   : > { %574 = vrot.lane.b32.xlu1 %v559_v33, %s878_s13 }
 0x18b   : > { %576 = vrot.lane.b32.xlu0 %v560_v35, %s878_s13 }
 0x18d   : > { %564 = vrot.lane.b32.xlu1 %v559_v33, %s880_s14 }
 0x18f   : > { %566 = vrot.lane.b32.xlu0 %v560_v35, %s880_s14 }
 0x191   : > { %741 = vperm.xlu1 %848, %v562_v38  }
 0x193   : > { %748 = vperm.xlu0 %847, %v563_v39  }
 0x1e3   : > { %v637_v40 = vpop.permute.xlu1 %636 }
 0x1e5   : > { %v639_v41 = vpop.permute.xlu0 %638 }
 0x1e6   : > { %v640_v42 = vsel %vm440_vm2, %v637_v40, %v639_v41  ;;  %v641_v43 = vsel %vm440_vm2, %v639_v41, %v637_v40 }
 0x1e7   : > { %v627_v44 = vpop.permute.xlu1 %626  ;;  %850 = vmatprep.subr.msk.mxu1 %vm979_vm4, %v641_v43 }
 0x1e8   : > { %851 = vmatpush1.msk.msra.mxu1 %vm971_vm3, %v640_v42 }
 0x1e9   : > { %v629_v45 = vpop.permute.xlu0 %628 }
 0x1ea   : > { %v630_v46 = vsel %vm419_vm6, %v627_v44, %v629_v45  ;;  %v631_v47 = vsel %vm419_vm6, %v629_v45, %v627_v44 }
 0x1eb   : > { %v617_v48 = vpop.permute.xlu1 %616  ;;  %852 = vmatprep.subr.msk.mxu1 %vm291_vm1, %v631_v47  ;;  %vm1219_vm1 = vcmp.lt.s32.totalorder %v958_v7, 1 }
 0x1ec   : > { %685 = vmatpush1.msra.mxu1 %v630_v46  ;;  %vm1220_vm2 = vmmov %vm1219_vm1 }
 0x1ed   : > { %v619_v49 = vpop.permute.xlu0 %618 }
 0x1ee   : > { %v620_v15 = vsel %vm402_vm8, %v617_v48, %v619_v49  ;;  %v621_v50 = vsel %vm402_vm8, %v619_v49, %v617_v48 }
 0x1ef   : > { %v607_v51 = vpop.permute.xlu1 %606  ;;  %853 = vmatprep.subr.msk.mxu1 %vm1020_vm10, %v621_v50 }
 0x1f0   : > { %854 = vmatpush1.msk.msra.mxu1 %vm1012_vm9, %v620_v15 }
 0x1f1   : > { %v609_v52 = vpop.permute.xlu0 %608 }
 0x1f2   : > { %v610_v8 = vsel %vm381_vm5, %v607_v51, %v609_v52  ;;  %v611_v53 = vsel %vm381_vm5, %v609_v52, %v607_v51  ;;  %vm1223_vm5 = vcmp.ge.s32.totalorder %v958_v7, 16 }
 0x1f3   : > { %v595_v55 = vpop.permute.xlu1 %594  ;;  %855 = vmatprep.subr.msk.mxu1 %vm965_vm0, %v611_v53  ;;  %vm1224_vm6 = vmmov %vm1223_vm5 }
 0x1f4   : > { %856 = vmatpush1.msk.msra.mxu1 %vm971_vm3, %v610_v8  ;;  %vm1221_vm3 = vcmp.lt.s32.totalorder %v958_v7, 15 }
 0x1f5   : > { %v597_v56 = vpop.permute.xlu0 %596  ;;  %690 = vmatprep.subr.mxu1 %v560_v35  ;;  %vm1222_vm4 = vmmov %vm1221_vm3 }
 0x1f6   : > { %v598_v37 = vsel %vm1219_vm1, %v595_v55, %v597_v56  ;;  %v599_v57 = vsel %vm1220_vm2, %v597_v56, %v595_v55  ;;  %691 = vmatpush1.msra.mxu1 %v559_v33 }
 0x1f7   : > { %v600_v58 = vsel %vm1012_vm9, %v599_v57, 0.0  ;;  %v601_v59 = vsel %vm993_vm7, %v598_v37, 0.0  ;;  %v585_v60 = vpop.permute.xlu1 %584  ;;  %857 = vmatprep.subr.msk.mxu1 %vm993_vm7, %v598_v37 }
 0x1f8   : > { %602 = vst [vmem:[#allocation2 + $0x70] sm:$0xff] %v600_v58  ;;  %603 = vst [vmem:[#allocation2 + $0x80] sm:$0xff] %v601_v59  ;;  %858 = vmatpush1.msk.msra.mxu1 %vm1012_vm9, %v599_v57 }
 0x1f9   : > { %v587_v14 = vpop.permute.xlu0 %586 }
 0x1fa   : > { %v588_v61 = vsel %vm1221_vm3, %v585_v60, %v587_v14  ;;  %v589_v62 = vsel %vm1222_vm4, %v587_v14, %v585_v60 }
 0x1fb   : > { %v590_v63 = vsel %vm1047_vm15, %v589_v62, 0.0  ;;  %v591_v0 = vsel %vm965_vm0, %v588_v61, 0.0  ;;  %v575_v1 = vpop.permute.xlu1 %574  ;;  %859 = vmatprep.subr.msk.mxu1 %vm965_vm0, %v588_v61  ;;  %vm664_vm0 = vcmask 588800  }
 0x1fc   : > { %592 = vst [vmem:[#allocation2 + $0x20] sm:$0xff] %v590_v63  ;;  %593 = vst [vmem:[#allocation2 + $0x8] sm:$0xff] %v591_v0  ;;  %860 = vmatpush1.msk.msra.mxu1 %vm1047_vm15, %v589_v62 }
 0x1fd   : > { %v577_v36 = vpop.permute.xlu0 %576 }
 0x1fe   : > { %v578_v2 = vsel %vm320_vm11, %v575_v1, %v577_v36  ;;  %v579_v3 = vsel %vm320_vm11, %v577_v36, %v575_v1 }
 0x1ff   : > { %v580_v4 = vsel %vm1223_vm5, %v579_v3, 0.0  ;;  %583 = vst [vmem:[#allocation2 + $0x58] sm:$0xff] %v578_v2  ;;  %696 = vmatprep.subr.mxu1 %v578_v2  ;;  %v565_v13 = vpop.permute.xlu1 %564 }
 0x200   : > { %582 = vst [vmem:[#allocation2 + $0x78] sm:$0xff] %v580_v4  ;;  %861 = vmatpush1.msk.msra.mxu1 %vm1224_vm6, %v579_v3 }
 0x201   : > { %v567_v5 = vpop.permute.xlu0 %566 }
 0x202   : > { %v568_v54 = vsel %vm303_vm14, %v565_v13, %v567_v5  ;;  %v569_v6 = vsel %vm303_vm14, %v567_v5, %v565_v13 }
 0x203   : > { %v570_v9 = vsel %vm1071_vm12, %v569_v6, 0.0  ;;  %v571_v11 = vsel %vm993_vm7, %v568_v54, 0.0  ;;  %862 = vmatprep.subr.msk.mxu1 %vm993_vm7, %v568_v54 }
 0x204   : > { %572 = vst [vmem:[#allocation2] sm:$0xff] %v570_v9  ;;  %573 = vst [vmem:[#allocation2 + $0x38] sm:$0xff] %v571_v11  ;;  %863 = vmatpush1.msk.msra.mxu1 %vm1071_vm12, %v569_v6 }
 0x205   : > { %824 = vmatmul.mubr.msk.f32.vlgmr.msra.gmra.mxu1 %vm664_vm0, %v561_v12 }
 0x20c   : > { %v742_v7 = vpop.permute.xlu1 %741 }
 0x20e   : > { %v749_v18 = vpop.permute.xlu0 %748 }
 0x2c5   : > { %v734_v16 = vpop.f32.mrf.mxu1 }
 0x2c6   : > { %v744_v17 = vmul.f32 %v742_v7, %v734_v16 }
 0x2c7   : > { %v736_v19 = vpop.f32.mrf.mxu1 }
 0x2c8   : > { %v751_v20 = vadd.f32 %v749_v18, %v744_v17  ;;  %v745_v21 = vmul.f32 %v742_v7, %v736_v19 }
 0x2ca   : > { %v753_v22 = vmax.f32 %v751_v20, 0.0  ;;  %v752_v23 = vadd.f32 %v749_v18, %v745_v21 }
 0x2cc   : > { %755 = vst [vmem:[%s278_s9] sm:$0xff] %v753_v22  ;;  %v754_v24 = vmax.f32 %v752_v23, 0.0 }
 0x2ce   : > { %756 = vst [vmem:[%s278_s9 + $0x8] sm:$0xff] %v754_v24 }
 0x2cf PF: > { %s17_s24 = sadd.s32 1, %s870_s24  }
 0x2d0   : > { %p14_p4 = scmp.ge.s32.totalorder %s17_s24, 4  }
 0x2d2   :  { %16 = sbr.rel (!%p14_p4) target bundleno = 1 (0x1), region = 78 }

</bundles_post_ra>
